<compile_context>
chip_gen: v7x
topology: tpu7x:2x2x1
jax: 0.10.0
libtpu: 0.0.40
codegen_flags: <defaults>
</compile_context>

<pallas_src>
import jax
import jax.numpy as jnp
import numpy as np
from jax.experimental import pallas as pl
from jax.experimental.pallas import tpu as pltpu

_LUMA_W = (0.299, 0.587, 0.114)
_W5 = (1.0, 4.0, 6.0, 4.0, 1.0)            # binomial; (w/16) outer (w/16) == 5x5/256

# Full 5x5 kernel, used only by the pure-JAX reference check.
_GK = np.outer(np.asarray(_W5), np.asarray(_W5)).astype(np.float32) / 256.0


def _take1(x, idx, axis):
    # Static width-1 slice along `axis`; kept size-1 so jnp.where broadcasts it.
    return jax.lax.slice_in_dim(x, idx, idx + 1, axis=axis)


def _shift_reflect(x, d, axis):
    """y[..., j, ...] = x[..., r(j + d), ...] along `axis`, torch 'reflect' borders:
    r(i) = -i for i < 0, 2*(n-1) - i for i > n-1.

    One XLU rotate (pltpu.roll) + |d| boundary fixups, instead of materializing a
    reflect-padded array with narrow concatenates and misaligned slices.
    """
    n = x.shape[axis]
    if d == 0:
        return x
    # pltpu.roll follows jnp.roll semantics: out[j] = x[(j - shift) % n],
    # so shift = (-d) % n yields x[j + d] wherever the index does not wrap.
    y = pltpu.roll(x, (-d) % n, axis=axis)
    idx = jax.lax.broadcasted_iota(jnp.int32, x.shape, axis)
    if d > 0:
        # wrapped positions j in [n - d, n): want x[2*(n-1) - (j + d)]
        for j in range(n - d, n):
            y = jnp.where(idx == j, _take1(x, 2 * (n - 1) - (j + d), axis), y)
    else:
        # wrapped positions j in [0, -d): want x[-(j + d)]
        for j in range(0, -d):
            y = jnp.where(idx == j, _take1(x, -(j + d), axis), y)
    return y


def _blur5_1d(x, axis):
    """5-tap [1,4,6,4,1]/16 binomial filter along `axis` with reflect(2) borders."""
    acc = (_W5[2] / 16.0) * x
    for d in (1, 2):
        w = _W5[2 - d] / 16.0
        acc = acc + w * (_shift_reflect(x, d, axis) + _shift_reflect(x, -d, axis))
    return acc


def highpass_stats_kernel(img_ref, hp_ref, min_ref, max_ref):
    img = img_ref[...]                                        # (Bt, 3, H, W)
    lum = (_LUMA_W[0] * img[:, 0]
           + _LUMA_W[1] * img[:, 1]
           + _LUMA_W[2] * img[:, 2])                          # (Bt, H, W)

    # Separable 5x5/256 Gaussian: vertical (sublane) pass, then horizontal (lane) pass.
    blur = _blur5_1d(_blur5_1d(lum, axis=1), axis=2)

    hp = jnp.clip(lum - blur + 0.5, 0.48, 0.52)
    hp_ref[...] = hp[:, None, :, :]

    # Per-grid-step min/max broadcast into an aligned (8,128) tile: no cross-iteration
    # dependency, so the batch grid axis is safe to mark "parallel".
    min_ref[...] = jnp.broadcast_to(jnp.min(hp), (1, 8, 128))
    max_ref[...] = jnp.broadcast_to(jnp.max(hp), (1, 8, 128))


def normalize_kernel(params_ref, hp_ref, out_ref):
    mn = params_ref[0]          # scalar from SMEM
    inv = params_ref[1]         # precomputed 1 / (max - min + 1e-8)
    out_ref[...] = (hp_ref[...] - mn) * inv


def _pick_batch_tile(B, H, W, budget_bytes=12 * 1024 * 1024):
    # ~(3+1) f32 blocks double-buffered + a handful of f32 temporaries per batch item.
    per_item = 18 * H * W * 4
    bt = int(max(1, min(B, budget_bytes // per_item)))
    while B % bt:
        bt -= 1
    return bt


@jax.jit
def high_pass_filter(img):
    B, C, H, W = img.shape
    assert C == 3, "expects RGB NCHW input"
    assert H >= 3 and W >= 3, "reflect(2) padding needs H, W >= 3"

    img = img.astype(jnp.float32)
    bt = _pick_batch_tile(B, H, W)      # batch items per grid step (amortizes step overhead)
    nb = B // bt
    cparams = pltpu.CompilerParams(dimension_semantics=("parallel",),
                                   vmem_limit_bytes=32 * 1024 * 1024)

    hp, mins, maxs = pl.pallas_call(
        highpass_stats_kernel,
        out_shape=(jax.ShapeDtypeStruct((B, 1, H, W), jnp.float32),
                   jax.ShapeDtypeStruct((nb, 8, 128), jnp.float32),
                   jax.ShapeDtypeStruct((nb, 8, 128), jnp.float32)),
        grid=(nb,),
        in_specs=[pl.BlockSpec((bt, 3, H, W), lambda i: (i, 0, 0, 0))],
        out_specs=(pl.BlockSpec((bt, 1, H, W), lambda i: (i, 0, 0, 0)),
                   pl.BlockSpec((1, 8, 128), lambda i: (i, 0, 0)),
                   pl.BlockSpec((1, 8, 128), lambda i: (i, 0, 0))),
        compiler_params=cparams,
    )(img)

    # Tiny global reduction + one scalar reciprocal (keeps pass 2 to a single vector multiply).
    mn = jnp.min(mins)
    mx = jnp.max(maxs)
    params = jnp.stack([mn, 1.0 / (mx - mn + 1e-8)]).astype(jnp.float32)

    out = pl.pallas_call(
        normalize_kernel,
        out_shape=jax.ShapeDtypeStruct((B, 1, H, W), jnp.float32),
        grid=(nb,),
        in_specs=[pl.BlockSpec(memory_space=pltpu.SMEM),
                  pl.BlockSpec((bt, 1, H, W), lambda i: (i, 0, 0, 0))],
        out_specs=pl.BlockSpec((bt, 1, H, W), lambda i: (i, 0, 0, 0)),
        input_output_aliases={1: 0},        # reuse the hp buffer as the output buffer
        compiler_params=cparams,
    )(params, hp)
    return out


def reference(img):
    # Pure-JAX reference of the torch forward (non-separable 25-tap blur) for correctness.
    w = jnp.array(_LUMA_W, dtype=jnp.float32).reshape(1, 3, 1, 1)
    lum = (img * w).sum(axis=1, keepdims=True)
    padded = jnp.pad(lum, ((0, 0), (0, 0), (2, 2), (2, 2)), mode="reflect")
    B, _, H, W = img.shape
    k = jnp.asarray(_GK)
    blur = jnp.zeros_like(lum)
    for di in range(5):
        for dj in range(5):
            blur = blur + k[di, dj] * padded[:, :, di:di + H, dj:dj + W]
    hp = jnp.clip(lum - blur + 0.5, 0.48, 0.52)
    mn, mx = hp.min(), hp.max()
    return (hp - mn) / (mx - mn + 1e-8)


if __name__ == "__main__":
    key = jax.random.PRNGKey(0)
    img = jax.random.uniform(key, (2, 3, 16, 16), dtype=jnp.float32)

    out = jax.block_until_ready(high_pass_filter(img))

    ref = reference(img)
    np.testing.assert_allclose(np.asarray(out), np.asarray(ref), rtol=2e-5, atol=2e-5)
    print("KERNEL_OK")
</pallas_src>

<mosaic_0001>
module attributes {stable_mosaic.version = 11 : i64} {
  func.func @highpass_stats_kernel(%arg0: i32, %arg1: memref<2x3x16x16xf32, #tpu.memory_space<vmem>>, %arg2: memref<2x1x16x16xf32, #tpu.memory_space<vmem>>, %arg3: memref<1x8x128xf32, #tpu.memory_space<vmem>>, %arg4: memref<1x8x128xf32, #tpu.memory_space<vmem>>) attributes {dimension_semantics = [#tpu.dimension_semantics<parallel>], iteration_bounds = array<i64: 1>, scalar_prefetch = 0 : i64, scratch_operands = 0 : i64, tpu.core_type = #tpu.core_type<tc>, window_params = [{transform_indices = @transform_0, window_bounds = array<i64: 2, 3, 16, 16>}, {transform_indices = @transform_1, window_bounds = array<i64: 2, 1, 16, 16>}, {transform_indices = @transform_2, window_bounds = array<i64: 1, 8, 128>}, {transform_indices = @transform_3, window_bounds = array<i64: 1, 8, 128>}]} {
    %c0 = arith.constant 0 : index
    %c0_0 = arith.constant 0 : index
    %c0_1 = arith.constant 0 : index
    %c0_2 = arith.constant 0 : index
    %0 = vector.load %arg1[%c0, %c0_0, %c0_1, %c0_2] : memref<2x3x16x16xf32, #tpu.memory_space<vmem>>, vector<2x3x16x16xf32>
    %1 = vector.extract_strided_slice %0 {offsets = [0, 0, 0, 0], sizes = [2, 1, 16, 16], strides = [1, 1, 1, 1]} : vector<2x3x16x16xf32> to vector<2x1x16x16xf32>
    %2 = vector.shape_cast %1 : vector<2x1x16x16xf32> to vector<2x16x16xf32>
    %cst = arith.constant 2.990000e-01 : f32
    %3 = vector.broadcast %cst : f32 to vector<2x16x16xf32>
    %4 = arith.mulf %3, %2 : vector<2x16x16xf32>
    %5 = vector.extract_strided_slice %0 {offsets = [0, 1, 0, 0], sizes = [2, 1, 16, 16], strides = [1, 1, 1, 1]} : vector<2x3x16x16xf32> to vector<2x1x16x16xf32>
    %6 = vector.shape_cast %5 : vector<2x1x16x16xf32> to vector<2x16x16xf32>
    %cst_3 = arith.constant 5.870000e-01 : f32
    %7 = vector.broadcast %cst_3 : f32 to vector<2x16x16xf32>
    %8 = arith.mulf %7, %6 : vector<2x16x16xf32>
    %9 = arith.addf %4, %8 : vector<2x16x16xf32>
    %10 = vector.extract_strided_slice %0 {offsets = [0, 2, 0, 0], sizes = [2, 1, 16, 16], strides = [1, 1, 1, 1]} : vector<2x3x16x16xf32> to vector<2x1x16x16xf32>
    %11 = vector.shape_cast %10 : vector<2x1x16x16xf32> to vector<2x16x16xf32>
    %cst_4 = arith.constant 1.140000e-01 : f32
    %12 = vector.broadcast %cst_4 : f32 to vector<2x16x16xf32>
    %13 = arith.mulf %12, %11 : vector<2x16x16xf32>
    %14 = arith.addf %9, %13 : vector<2x16x16xf32>
    %cst_5 = arith.constant 3.750000e-01 : f32
    %15 = vector.broadcast %cst_5 : f32 to vector<2x16x16xf32>
    %16 = arith.mulf %15, %14 : vector<2x16x16xf32>
    %c15_i32 = arith.constant 15 : i32
    %17 = tpu.dynamic_rotate %14 by %c15_i32 dim 1 : vector<2x16x16xf32>, i32 -> vector<2x16x16xf32>
    %18 = tpu.iota {dimensions = array<i32: 1>} : vector<2x16x16xi32>
    %c15_i32_6 = arith.constant 15 : i32
    %19 = vector.broadcast %c15_i32_6 : i32 to vector<2x16x16xi32>
    %20 = arith.cmpi eq, %18, %19 : vector<2x16x16xi32>
    %21 = vector.extract_strided_slice %14 {offsets = [0, 14, 0], sizes = [2, 1, 16], strides = [1, 1, 1]} : vector<2x16x16xf32> to vector<2x1x16xf32>
    %22 = vector.shape_cast %21 : vector<2x1x16xf32> to vector<2x1x16xf32>
    %23 = vector.broadcast %22 : vector<2x1x16xf32> to vector<2x16x16xf32>
    %24 = arith.select %20, %23, %17 : vector<2x16x16xi1>, vector<2x16x16xf32>
    %c1_i32 = arith.constant 1 : i32
    %25 = tpu.dynamic_rotate %14 by %c1_i32 dim 1 : vector<2x16x16xf32>, i32 -> vector<2x16x16xf32>
    %26 = tpu.iota {dimensions = array<i32: 1>} : vector<2x16x16xi32>
    %c0_i32 = arith.constant 0 : i32
    %27 = vector.broadcast %c0_i32 : i32 to vector<2x16x16xi32>
    %28 = arith.cmpi eq, %26, %27 : vector<2x16x16xi32>
    %29 = vector.extract_strided_slice %14 {offsets = [0, 1, 0], sizes = [2, 1, 16], strides = [1, 1, 1]} : vector<2x16x16xf32> to vector<2x1x16xf32>
    %30 = vector.shape_cast %29 : vector<2x1x16xf32> to vector<2x1x16xf32>
    %31 = vector.broadcast %30 : vector<2x1x16xf32> to vector<2x16x16xf32>
    %32 = arith.select %28, %31, %25 : vector<2x16x16xi1>, vector<2x16x16xf32>
    %33 = arith.addf %24, %32 : vector<2x16x16xf32>
    %cst_7 = arith.constant 2.500000e-01 : f32
    %34 = vector.broadcast %cst_7 : f32 to vector<2x16x16xf32>
    %35 = arith.mulf %34, %33 : vector<2x16x16xf32>
    %36 = arith.addf %16, %35 : vector<2x16x16xf32>
    %c14_i32 = arith.constant 14 : i32
    %37 = tpu.dynamic_rotate %14 by %c14_i32 dim 1 : vector<2x16x16xf32>, i32 -> vector<2x16x16xf32>
    %38 = tpu.iota {dimensions = array<i32: 1>} : vector<2x16x16xi32>
    %c14_i32_8 = arith.constant 14 : i32
    %39 = vector.broadcast %c14_i32_8 : i32 to vector<2x16x16xi32>
    %40 = arith.cmpi eq, %38, %39 : vector<2x16x16xi32>
    %41 = vector.extract_strided_slice %14 {offsets = [0, 14, 0], sizes = [2, 1, 16], strides = [1, 1, 1]} : vector<2x16x16xf32> to vector<2x1x16xf32>
    %42 = vector.shape_cast %41 : vector<2x1x16xf32> to vector<2x1x16xf32>
    %43 = vector.broadcast %42 : vector<2x1x16xf32> to vector<2x16x16xf32>
    %44 = arith.select %40, %43, %37 : vector<2x16x16xi1>, vector<2x16x16xf32>
    %c15_i32_9 = arith.constant 15 : i32
    %45 = vector.broadcast %c15_i32_9 : i32 to vector<2x16x16xi32>
    %46 = arith.cmpi eq, %38, %45 : vector<2x16x16xi32>
    %47 = vector.extract_strided_slice %14 {offsets = [0, 13, 0], sizes = [2, 1, 16], strides = [1, 1, 1]} : vector<2x16x16xf32> to vector<2x1x16xf32>
    %48 = vector.shape_cast %47 : vector<2x1x16xf32> to vector<2x1x16xf32>
    %49 = vector.broadcast %48 : vector<2x1x16xf32> to vector<2x16x16xf32>
    %50 = arith.select %46, %49, %44 : vector<2x16x16xi1>, vector<2x16x16xf32>
    %c2_i32 = arith.constant 2 : i32
    %51 = tpu.dynamic_rotate %14 by %c2_i32 dim 1 : vector<2x16x16xf32>, i32 -> vector<2x16x16xf32>
    %52 = tpu.iota {dimensions = array<i32: 1>} : vector<2x16x16xi32>
    %c0_i32_10 = arith.constant 0 : i32
    %53 = vector.broadcast %c0_i32_10 : i32 to vector<2x16x16xi32>
    %54 = arith.cmpi eq, %52, %53 : vector<2x16x16xi32>
    %55 = vector.extract_strided_slice %14 {offsets = [0, 2, 0], sizes = [2, 1, 16], strides = [1, 1, 1]} : vector<2x16x16xf32> to vector<2x1x16xf32>
    %56 = vector.shape_cast %55 : vector<2x1x16xf32> to vector<2x1x16xf32>
    %57 = vector.broadcast %56 : vector<2x1x16xf32> to vector<2x16x16xf32>
    %58 = arith.select %54, %57, %51 : vector<2x16x16xi1>, vector<2x16x16xf32>
    %c1_i32_11 = arith.constant 1 : i32
    %59 = vector.broadcast %c1_i32_11 : i32 to vector<2x16x16xi32>
    %60 = arith.cmpi eq, %52, %59 : vector<2x16x16xi32>
    %61 = vector.extract_strided_slice %14 {offsets = [0, 1, 0], sizes = [2, 1, 16], strides = [1, 1, 1]} : vector<2x16x16xf32> to vector<2x1x16xf32>
    %62 = vector.shape_cast %61 : vector<2x1x16xf32> to vector<2x1x16xf32>
    %63 = vector.broadcast %62 : vector<2x1x16xf32> to vector<2x16x16xf32>
    %64 = arith.select %60, %63, %58 : vector<2x16x16xi1>, vector<2x16x16xf32>
    %65 = arith.addf %50, %64 : vector<2x16x16xf32>
    %cst_12 = arith.constant 6.250000e-02 : f32
    %66 = vector.broadcast %cst_12 : f32 to vector<2x16x16xf32>
    %67 = arith.mulf %66, %65 : vector<2x16x16xf32>
    %68 = arith.addf %36, %67 : vector<2x16x16xf32>
    %cst_13 = arith.constant 3.750000e-01 : f32
    %69 = vector.broadcast %cst_13 : f32 to vector<2x16x16xf32>
    %70 = arith.mulf %69, %68 : vector<2x16x16xf32>
    %c15_i32_14 = arith.constant 15 : i32
    %71 = tpu.dynamic_rotate %68 by %c15_i32_14 dim 2 : vector<2x16x16xf32>, i32 -> vector<2x16x16xf32>
    %72 = tpu.iota {dimensions = array<i32: 2>} : vector<2x16x16xi32>
    %c15_i32_15 = arith.constant 15 : i32
    %73 = vector.broadcast %c15_i32_15 : i32 to vector<2x16x16xi32>
    %74 = arith.cmpi eq, %72, %73 : vector<2x16x16xi32>
    %75 = vector.extract_strided_slice %68 {offsets = [0, 0, 14], sizes = [2, 16, 1], strides = [1, 1, 1]} : vector<2x16x16xf32> to vector<2x16x1xf32>
    %76 = vector.shape_cast %75 : vector<2x16x1xf32> to vector<2x16x1xf32>
    %77 = vector.broadcast %76 : vector<2x16x1xf32> to vector<2x16x16xf32>
    %78 = arith.select %74, %77, %71 : vector<2x16x16xi1>, vector<2x16x16xf32>
    %c1_i32_16 = arith.constant 1 : i32
    %79 = tpu.dynamic_rotate %68 by %c1_i32_16 dim 2 : vector<2x16x16xf32>, i32 -> vector<2x16x16xf32>
    %80 = tpu.iota {dimensions = array<i32: 2>} : vector<2x16x16xi32>
    %c0_i32_17 = arith.constant 0 : i32
    %81 = vector.broadcast %c0_i32_17 : i32 to vector<2x16x16xi32>
    %82 = arith.cmpi eq, %80, %81 : vector<2x16x16xi32>
    %83 = vector.extract_strided_slice %68 {offsets = [0, 0, 1], sizes = [2, 16, 1], strides = [1, 1, 1]} : vector<2x16x16xf32> to vector<2x16x1xf32>
    %84 = vector.shape_cast %83 : vector<2x16x1xf32> to vector<2x16x1xf32>
    %85 = vector.broadcast %84 : vector<2x16x1xf32> to vector<2x16x16xf32>
    %86 = arith.select %82, %85, %79 : vector<2x16x16xi1>, vector<2x16x16xf32>
    %87 = arith.addf %78, %86 : vector<2x16x16xf32>
    %cst_18 = arith.constant 2.500000e-01 : f32
    %88 = vector.broadcast %cst_18 : f32 to vector<2x16x16xf32>
    %89 = arith.mulf %88, %87 : vector<2x16x16xf32>
    %90 = arith.addf %70, %89 : vector<2x16x16xf32>
    %c14_i32_19 = arith.constant 14 : i32
    %91 = tpu.dynamic_rotate %68 by %c14_i32_19 dim 2 : vector<2x16x16xf32>, i32 -> vector<2x16x16xf32>
    %92 = tpu.iota {dimensions = array<i32: 2>} : vector<2x16x16xi32>
    %c14_i32_20 = arith.constant 14 : i32
    %93 = vector.broadcast %c14_i32_20 : i32 to vector<2x16x16xi32>
    %94 = arith.cmpi eq, %92, %93 : vector<2x16x16xi32>
    %95 = vector.extract_strided_slice %68 {offsets = [0, 0, 14], sizes = [2, 16, 1], strides = [1, 1, 1]} : vector<2x16x16xf32> to vector<2x16x1xf32>
    %96 = vector.shape_cast %95 : vector<2x16x1xf32> to vector<2x16x1xf32>
    %97 = vector.broadcast %96 : vector<2x16x1xf32> to vector<2x16x16xf32>
    %98 = arith.select %94, %97, %91 : vector<2x16x16xi1>, vector<2x16x16xf32>
    %c15_i32_21 = arith.constant 15 : i32
    %99 = vector.broadcast %c15_i32_21 : i32 to vector<2x16x16xi32>
    %100 = arith.cmpi eq, %92, %99 : vector<2x16x16xi32>
    %101 = vector.extract_strided_slice %68 {offsets = [0, 0, 13], sizes = [2, 16, 1], strides = [1, 1, 1]} : vector<2x16x16xf32> to vector<2x16x1xf32>
    %102 = vector.shape_cast %101 : vector<2x16x1xf32> to vector<2x16x1xf32>
    %103 = vector.broadcast %102 : vector<2x16x1xf32> to vector<2x16x16xf32>
    %104 = arith.select %100, %103, %98 : vector<2x16x16xi1>, vector<2x16x16xf32>
    %c2_i32_22 = arith.constant 2 : i32
    %105 = tpu.dynamic_rotate %68 by %c2_i32_22 dim 2 : vector<2x16x16xf32>, i32 -> vector<2x16x16xf32>
    %106 = tpu.iota {dimensions = array<i32: 2>} : vector<2x16x16xi32>
    %c0_i32_23 = arith.constant 0 : i32
    %107 = vector.broadcast %c0_i32_23 : i32 to vector<2x16x16xi32>
    %108 = arith.cmpi eq, %106, %107 : vector<2x16x16xi32>
    %109 = vector.extract_strided_slice %68 {offsets = [0, 0, 2], sizes = [2, 16, 1], strides = [1, 1, 1]} : vector<2x16x16xf32> to vector<2x16x1xf32>
    %110 = vector.shape_cast %109 : vector<2x16x1xf32> to vector<2x16x1xf32>
    %111 = vector.broadcast %110 : vector<2x16x1xf32> to vector<2x16x16xf32>
    %112 = arith.select %108, %111, %105 : vector<2x16x16xi1>, vector<2x16x16xf32>
    %c1_i32_24 = arith.constant 1 : i32
    %113 = vector.broadcast %c1_i32_24 : i32 to vector<2x16x16xi32>
    %114 = arith.cmpi eq, %106, %113 : vector<2x16x16xi32>
    %115 = vector.extract_strided_slice %68 {offsets = [0, 0, 1], sizes = [2, 16, 1], strides = [1, 1, 1]} : vector<2x16x16xf32> to vector<2x16x1xf32>
    %116 = vector.shape_cast %115 : vector<2x16x1xf32> to vector<2x16x1xf32>
    %117 = vector.broadcast %116 : vector<2x16x1xf32> to vector<2x16x16xf32>
    %118 = arith.select %114, %117, %112 : vector<2x16x16xi1>, vector<2x16x16xf32>
    %119 = arith.addf %104, %118 : vector<2x16x16xf32>
    %cst_25 = arith.constant 6.250000e-02 : f32
    %120 = vector.broadcast %cst_25 : f32 to vector<2x16x16xf32>
    %121 = arith.mulf %120, %119 : vector<2x16x16xf32>
    %122 = arith.addf %90, %121 : vector<2x16x16xf32>
    %123 = arith.subf %14, %122 : vector<2x16x16xf32>
    %cst_26 = arith.constant 5.000000e-01 : f32
    %124 = vector.broadcast %cst_26 : f32 to vector<2x16x16xf32>
    %125 = arith.addf %123, %124 : vector<2x16x16xf32>
    %cst_27 = arith.constant 4.800000e-01 : f32
    %cst_28 = arith.constant 5.200000e-01 : f32
    %126 = vector.broadcast %cst_27 : f32 to vector<2x16x16xf32>
    %127 = arith.maximumf %126, %125 : vector<2x16x16xf32>
    %128 = vector.broadcast %cst_28 : f32 to vector<2x16x16xf32>
    %129 = arith.minimumf %128, %127 : vector<2x16x16xf32>
    %130 = vector.shape_cast %129 : vector<2x16x16xf32> to vector<2x1x16x16xf32>
    %c0_29 = arith.constant 0 : index
    %c0_30 = arith.constant 0 : index
    %c0_31 = arith.constant 0 : index
    %c0_32 = arith.constant 0 : index
    %131 = vector.load %arg2[%c0_29, %c0_30, %c0_31, %c0_32] : memref<2x1x16x16xf32, #tpu.memory_space<vmem>>, vector<2x1x16x16xf32>
    tpu.vector_store %arg2[%c0_29, %c0_30, %c0_31, %c0_32], %130 {strides = array<i32>} : memref<2x1x16x16xf32, #tpu.memory_space<vmem>>, vector<2x1x16x16xf32>,
    %132 = vector.shape_cast %129 : vector<2x16x16xf32> to vector<1x2x16x16xf32>
    %cst_33 = arith.constant dense<0x7F800000> : vector<1xf32>
    %133 = vector.multi_reduction <minimumf>, %132, %cst_33 [1, 2, 3] : vector<1x2x16x16xf32> to vector<1xf32>
    %134 = vector.shape_cast %133 : vector<1xf32> to vector<1x1x1x1xf32>
    %135 = vector.extract %134[0, 0, 0, 0] : f32 from vector<1x1x1x1xf32>
    %136 = vector.broadcast %135 : f32 to vector<1x8x128xf32>
    %c0_34 = arith.constant 0 : index
    %c0_35 = arith.constant 0 : index
    %c0_36 = arith.constant 0 : index
    %137 = vector.load %arg3[%c0_34, %c0_35, %c0_36] : memref<1x8x128xf32, #tpu.memory_space<vmem>>, vector<1x8x128xf32>
    tpu.vector_store %arg3[%c0_34, %c0_35, %c0_36], %136 {strides = array<i32>} : memref<1x8x128xf32, #tpu.memory_space<vmem>>, vector<1x8x128xf32>,
    %138 = vector.shape_cast %129 : vector<2x16x16xf32> to vector<1x2x16x16xf32>
    %cst_37 = arith.constant dense<0xFF800000> : vector<1xf32>
    %139 = vector.multi_reduction <maximumf>, %138, %cst_37 [1, 2, 3] : vector<1x2x16x16xf32> to vector<1xf32>
    %140 = vector.shape_cast %139 : vector<1xf32> to vector<1x1x1x1xf32>
    %141 = vector.extract %140[0, 0, 0, 0] : f32 from vector<1x1x1x1xf32>
    %142 = vector.broadcast %141 : f32 to vector<1x8x128xf32>
    %c0_38 = arith.constant 0 : index
    %c0_39 = arith.constant 0 : index
    %c0_40 = arith.constant 0 : index
    %143 = vector.load %arg4[%c0_38, %c0_39, %c0_40] : memref<1x8x128xf32, #tpu.memory_space<vmem>>, vector<1x8x128xf32>
    tpu.vector_store %arg4[%c0_38, %c0_39, %c0_40], %142 {strides = array<i32>} : memref<1x8x128xf32, #tpu.memory_space<vmem>>, vector<1x8x128xf32>,
    return
  }
  func.func @transform_0(%arg0: i32) -> (i32, i32, i32, i32) {
    %c0_i32 = arith.constant 0 : i32
    %c0_i32_0 = arith.constant 0 : i32
    %c0_i32_1 = arith.constant 0 : i32
    %c0_i32_2 = arith.constant 0 : i32
    return %arg0, %c0_i32, %c0_i32_0, %c0_i32_1 : i32, i32, i32, i32
  }
  func.func @transform_1(%arg0: i32) -> (i32, i32, i32, i32) {
    %c0_i32 = arith.constant 0 : i32
    %c0_i32_0 = arith.constant 0 : i32
    %c0_i32_1 = arith.constant 0 : i32
    %c0_i32_2 = arith.constant 0 : i32
    return %arg0, %c0_i32, %c0_i32_0, %c0_i32_1 : i32, i32, i32, i32
  }
  func.func @transform_2(%arg0: i32) -> (i32, i32, i32) {
    %c0_i32 = arith.constant 0 : i32
    %c0_i32_0 = arith.constant 0 : i32
    %c0_i32_1 = arith.constant 0 : i32
    return %arg0, %c0_i32, %c0_i32_0 : i32, i32, i32
  }
  func.func @transform_3(%arg0: i32) -> (i32, i32, i32) {
    %c0_i32 = arith.constant 0 : i32
    %c0_i32_0 = arith.constant 0 : i32
    %c0_i32_1 = arith.constant 0 : i32
    return %arg0, %c0_i32, %c0_i32_0 : i32, i32, i32
  }
}

module attributes {stable_mosaic.version = 11 : i64} {
  func.func @normalize_kernel(%arg0: i32, %arg1: memref<2xf32, #tpu.memory_space<smem>>, %arg2: memref<2x1x16x16xf32, #tpu.memory_space<vmem>>, %arg3: memref<2x1x16x16xf32, #tpu.memory_space<vmem>>) attributes {dimension_semantics = [#tpu.dimension_semantics<parallel>], iteration_bounds = array<i64: 1>, scalar_prefetch = 0 : i64, scratch_operands = 0 : i64, tpu.core_type = #tpu.core_type<tc>, window_params = [{transform_indices = @transform_0, window_bounds = array<i64: 2>}, {transform_indices = @transform_1, window_bounds = array<i64: 2, 1, 16, 16>}, {transform_indices = @transform_2, window_bounds = array<i64: 2, 1, 16, 16>}]} {
    %c0 = arith.constant 0 : index
    %0 = memref.load %arg1[%c0] : memref<2xf32, #tpu.memory_space<smem>>
    %c1 = arith.constant 1 : index
    %1 = memref.load %arg1[%c1] : memref<2xf32, #tpu.memory_space<smem>>
    %c0_0 = arith.constant 0 : index
    %c0_1 = arith.constant 0 : index
    %c0_2 = arith.constant 0 : index
    %c0_3 = arith.constant 0 : index
    %2 = vector.load %arg2[%c0_0, %c0_1, %c0_2, %c0_3] : memref<2x1x16x16xf32, #tpu.memory_space<vmem>>, vector<2x1x16x16xf32>
    %3 = vector.broadcast %0 : f32 to vector<2x1x16x16xf32>
    %4 = arith.subf %2, %3 : vector<2x1x16x16xf32>
    %5 = vector.broadcast %1 : f32 to vector<2x1x16x16xf32>
    %6 = arith.mulf %4, %5 : vector<2x1x16x16xf32>
    %c0_4 = arith.constant 0 : index
    %c0_5 = arith.constant 0 : index
    %c0_6 = arith.constant 0 : index
    %c0_7 = arith.constant 0 : index
    %7 = vector.load %arg3[%c0_4, %c0_5, %c0_6, %c0_7] : memref<2x1x16x16xf32, #tpu.memory_space<vmem>>, vector<2x1x16x16xf32>
    tpu.vector_store %arg3[%c0_4, %c0_5, %c0_6, %c0_7], %6 {strides = array<i32>} : memref<2x1x16x16xf32, #tpu.memory_space<vmem>>, vector<2x1x16x16xf32>,
    return
  }
  func.func @transform_0(%arg0: i32) -> i32 {
    %c0_i32 = arith.constant 0 : i32
    %c0_i32_0 = arith.constant 0 : i32
    return %c0_i32 : i32
  }
  func.func @transform_1(%arg0: i32) -> (i32, i32, i32, i32) {
    %c0_i32 = arith.constant 0 : i32
    %c0_i32_0 = arith.constant 0 : i32
    %c0_i32_1 = arith.constant 0 : i32
    %c0_i32_2 = arith.constant 0 : i32
    return %arg0, %c0_i32, %c0_i32_0, %c0_i32_1 : i32, i32, i32, i32
  }
  func.func @transform_2(%arg0: i32) -> (i32, i32, i32, i32) {
    %c0_i32 = arith.constant 0 : i32
    %c0_i32_0 = arith.constant 0 : i32
    %c0_i32_1 = arith.constant 0 : i32
    %c0_i32_2 = arith.constant 0 : i32
    return %arg0, %c0_i32, %c0_i32_0, %c0_i32_1 : i32, i32, i32, i32
  }
}

</mosaic_0001>

<bundles_post_ra>
// kernel: high_pass_filter.3
= control target key start
LH: loop header
LB: loop body
LE: loop exit
PB: predicated region body
PF: predicated region fallthrough
CT: control target
= control target key end

     0   :  { %7 = vsyncpa [#allocation5], 0  ;;  %s199_s0 = inlined_call_operand.vmem [shape: f32[2], index: 0, kind: input, shape index: {}]   ;;  %s200_s1 = inlined_call_operand.hbm [shape: f32[2,1,16,16], index: 1, kind: input, shape index: {}, may-alias: {1,2}]   ;;  %s201_s2 = inlined_call_operand.hbm [shape: f32[2,1,16,16], index: 2, kind: output, shape index: {}, may-alias: {1,2}]  }
   0x1   :  { %8 = vsyncpa [#allocation3], 0 }
   0x2   :  { %9 = vsyncpa [#allocation4], 0  ;;  %s16_s11 = sshll.u32 %s199_s0, 4  ;;  %s17_s11 = int_to_ptr.vmem [resolvable:$true] %s16_s11 }
   0x3   :  { %s84_s12 = scalar_lea.vmem %s17_s11, 16  ;;  %p89_p1 = scmp.lt.s32.totalorder %s17_s11, %s17_s11 }
   0x4   :  { %p85_p0 = scmp.ne.s32.totalorder %s17_s11, %s84_s12  ;;  %p90_p2 = scmp.lt.s32.totalorder %s84_s12, %s84_s12 }
   0x6   :  { %p91_p3 = por %p90_p2, %p89_p1 }
   0x8   :  { %p92_p4 = pnand %p91_p3, %p85_p0 }
   0xa   :  { %95 = shalt.err (!%p92_p4)
}
   0xb   :  { %s146_s13 = smov [#allocation2]   ;;  %s147_s14 = smov [#allocation6]  }
   0xc   :  { %19 = dma.vmem_to_smem %s17_s11, 16, %s146_s13, [#allocation5]  }
   0xd   :  { %s25_s15 = sshll.u32 %s147_s14, 4  ;;  %s96_s18 = scalar_lea.hbm %s200_s1, 512  ;;  %s26_s15 = int_to_ptr.vmem [resolvable:$true] %s25_s15 }
   0xe   :  { %p97_p5 = scmp.ne.s32.totalorder %s200_s1, %s96_s18  ;;  %p100_p6 = scmp.lt.u32.totalorder %s96_s18, %s200_s1 }
  0x10   :  { %p102_p7 = pnand %p100_p6, %p97_p5 }
  0x12   :  { %105 = shalt.err (!%p102_p7)
}
  0x13   :  { %s106_s22 = scalar_lea.vmem %s26_s15, 512  ;;  %p111_p9 = scmp.lt.s32.totalorder %s26_s15, %s26_s15 }
  0x14   :  { %p107_p8 = scmp.ne.s32.totalorder %s26_s15, %s106_s22  ;;  %p112_p10 = scmp.lt.s32.totalorder %s106_s22, %s106_s22 }
  0x16   :  { %p113_p11 = por %p112_p10, %p111_p9 }
  0x18   :  { %p114_p12 = pnand %p113_p11, %p107_p8 }
  0x1a   :  { %117 = shalt.err (!%p114_p12)
}
  0x1b   :  { %s148_s23 = smov 128   ;;  %s149_s24 = smov 8  }
  0x1c   :  { %31 = dma.hbm_to_vmem [thread:$0]  %s200_s1, 512, %s26_s15, [#allocation3], %s148_s23, %s148_s23, %s149_s24  }
  0x1d   :  { %140 = dma.done.wait [#allocation5], 16  }
  0x1e   :  { %141 = vsyncadd [#allocation5], 4294967280 }
  0x1f   :  { %142 = dma.done.wait [#allocation3], 512  }
  0x20   :  { %143 = vsyncadd [#allocation3], 4294966784 }
  0x21   :  { %38 = sfence }
  0x22   :  { %s39_s27 = sld [smem:[#allocation2]]  ;;  %s78_s28 = sld [smem:[#allocation2 + $0x1]]  ;;  %v41_v0 = vld [vmem:[#allocation6] sm:$0xff]  ;;  %v42_v1 = vld [vmem:[#allocation6 + $0x8] sm:$0xff]  ;;  %v43_v2 = vld [vmem:[#allocation6 + $0x10] sm:$0xff]  ;;  %vm55_vm0 = vcmask 130048  }
  0x23   :  { %v44_v3 = vld [vmem:[#allocation6 + $0x18] sm:$0xff]  ;;  %s150_s29 = smov [#allocation7]  }
  0x24   :  { %s65_s30 = sshll.u32 %s150_s29, 4  ;;  %s66_s30 = int_to_ptr.vmem [resolvable:$true] %s65_s30 }
  0x25   :  { %s118_s1 = scalar_lea.vmem %s66_s30, 512  ;;  %p123_p0 = scmp.lt.s32.totalorder %s66_s30, %s66_s30 }
  0x26   :  { %p119_p13 = scmp.ne.s32.totalorder %s66_s30, %s118_s1  ;;  %p124_p1 = scmp.lt.s32.totalorder %s118_s1, %s118_s1 }
  0x28   :  { %v45_v4 = vstv %s39_s27  ;;  %v50_v5 = vstv %s78_s28  ;;  %p125_p2 = por %p124_p1, %p123_p0 }
  0x29   :  { %v46_v6 = vsub.f32 %v41_v0, %v45_v4  ;;  %v47_v7 = vsub.f32 %v42_v1, %v45_v4  ;;  %v48_v8 = vsub.f32 %v43_v2, %v45_v4  ;;  %v49_v9 = vsub.f32 %v44_v3, %v45_v4 }
  0x2a   :  { %p126_p3 = pnand %p125_p2, %p119_p13 }
  0x2b   :  { %v51_v10 = vmul.f32 %v50_v5, %v46_v6  ;;  %v52_v11 = vmul.f32 %v50_v5, %v47_v7  ;;  %v53_v12 = vmul.f32 %v50_v5, %v48_v8  ;;  %v54_v13 = vmul.f32 %v50_v5, %v49_v9 }
  0x2d   :  { %56 = vst.msk [vmem:[#allocation7] sm:$0xff] %vm55_vm0, %v51_v10  ;;  %57 = vst.msk [vmem:[#allocation7 + $0x8] sm:$0xff] %vm55_vm0, %v52_v11 }
  0x2e   :  { %58 = vst.msk [vmem:[#allocation7 + $0x10] sm:$0xff] %vm55_vm0, %v53_v12  ;;  %59 = vst.msk [vmem:[#allocation7 + $0x18] sm:$0xff] %vm55_vm0, %v54_v13 }
  0x2f   :  { %129 = shalt.err (!%p126_p3)
}
  0x30   :  { %s130_s5 = scalar_lea.hbm %s201_s2, 512 }
  0x31   :  { %p131_p4 = scmp.ne.s32.totalorder %s201_s2, %s130_s5  ;;  %p134_p5 = scmp.lt.u32.totalorder %s130_s5, %s201_s2 }
  0x33   :  { %p136_p6 = pnand %p134_p5, %p131_p4 }
  0x35   :  { %139 = shalt.err (!%p136_p6)
}
  0x36   :  { %71 = dma.vmem_to_hbm [thread:$0]  %s66_s30, 512, %s201_s2, [#allocation4], %s148_s23, %s148_s23, %s149_s24  }
  0x37   :  { %144 = dma.done.wait [#allocation4], 512  }
  0x38   :  { %145 = vsyncadd [#allocation4], 4294966784 }
  0x39   :  { %75 = vsyncpa [#allocation3], 1 }
  0x3a   :  { %76 = vsyncpa [#allocation4], 1 }
  0x3b   :  { %77 = vsyncpa [#allocation5], 1 }

// kernel: high_pass_filter.2
= control target key start
LH: loop header
LB: loop body
LE: loop exit
PB: predicated region body
PF: predicated region fallthrough
CT: control target
= control target key end

     0   :  { %9 = vsyncpa [#allocation3], 0  ;;  %s904_s0 = inlined_call_operand.hbm [shape: f32[2,3,16,16], index: 0, kind: input, shape index: {}]   ;;  %s905_s1 = inlined_call_operand.hbm [shape: f32[2,1,16,16], index: 1, kind: output, shape index: {0}]   ;;  %s906_s2 = inlined_call_operand.vmem [shape: f32[1,8,128], index: 2, kind: output, shape index: {1}]   ;;  %s907_s3 = inlined_call_operand.vmem [shape: f32[1,8,128], index: 3, kind: output, shape index: {2}]  }
   0x1   :  { %10 = vsyncpa [#allocation4], 0  ;;  %s548_s12 = smov [#allocation2]   ;;  %s500_s16 = scalar_lea.hbm %s904_s0, 1536 }
   0x2   :  { %s16_s13 = sshll.u32 %s548_s12, 4  ;;  %p501_p0 = scmp.ne.s32.totalorder %s904_s0, %s500_s16  ;;  %s17_s13 = int_to_ptr.vmem [resolvable:$true] %s16_s13 }
   0x3   :  { %p504_p1 = scmp.lt.u32.totalorder %s500_s16, %s904_s0 }
   0x5   :  { %p506_p2 = pnand %p504_p1, %p501_p0 }
   0x7   :  { %509 = shalt.err (!%p506_p2)
}
   0x8   :  { %s510_s21 = scalar_lea.vmem %s17_s13, 1536  ;;  %p515_p4 = scmp.lt.s32.totalorder %s17_s13, %s17_s13 }
   0x9   :  { %p511_p3 = scmp.ne.s32.totalorder %s17_s13, %s510_s21  ;;  %p516_p5 = scmp.lt.s32.totalorder %s510_s21, %s510_s21 }
   0xb   :  { %p517_p6 = por %p516_p5, %p515_p4 }
   0xd   :  { %p518_p7 = pnand %p517_p6, %p511_p3 }
   0xf   :  { %521 = shalt.err (!%p518_p7)
}
  0x10   :  { %s549_s22 = smov 128   ;;  %s550_s23 = smov 8  }
  0x11   :  { %22 = dma.hbm_to_vmem [thread:$0]  %s904_s0, 1536, %s17_s13, [#allocation3], %s549_s22, %s549_s22, %s550_s23  }
  0x12   :  { %544 = dma.done.wait [#allocation3], 1536  }
  0x13   :  { %545 = vsyncadd [#allocation3], 4294965760  ;;  %v66_v0 = vlaneseq  ;;  %v551_v1 = vmov 14   ;;  %v26_v3 = vld [vmem:[#allocation2] sm:$0xff]  ;;  %v27_v4 = vld [vmem:[#allocation2 + $0x8] sm:$0xff]  ;;  %s552_s0 = smov 16  }
  0x14   :  { %492 = vset.pattern.permute.xlu1 %v551_v1  ;;  %491 = vset.pattern.permute.xlu0 %v551_v1  ;;  %v28_v5 = vld [vmem:[#allocation2 + $0x10] sm:$0xff]  ;;  %v29_v7 = vld [vmem:[#allocation2 + $0x18] sm:$0xff]  ;;  %v30_v8 = vld [vmem:[#allocation2 + $0x20] sm:$0xff]  ;;  %v38_v10 = vmul.f32 0.299, %v26_v3  ;;  %vm193_vm8 = vcmask 1047680  }
  0x15   :  { %v597_v2 = vshrl.u32 %v66_v0, 7  ;;  %v31_v9 = vld [vmem:[#allocation2 + $0x28] sm:$0xff]  ;;  %v39_v11 = vmul.f32 0.299, %v27_v4  ;;  %v42_v12 = vmul.f32 0.587, %v28_v5 }
  0x16   :  { %v43_v13 = vmul.f32 0.587, %v29_v7  ;;  %v50_v14 = vmul.f32 0.114, %v30_v8  ;;  %v51_v15 = vmul.f32 0.114, %v31_v9 }
  0x17   :  { %vm68_vm0 = vcmp.lt.s32.totalorder %v597_v2, 7  ;;  %vm92_vm1 = vcmp.lt.s32.totalorder %v597_v2, 1  ;;  %v101_v6 = vsub.s32 1, %v597_v2  ;;  %vm127_vm2 = vcmp.lt.s32.totalorder %v597_v2, 6  ;;  %v32_v16 = vld [vmem:[#allocation2 + $0x30] sm:$0xff]  ;;  %v33_v17 = vld [vmem:[#allocation2 + $0x38] sm:$0xff] }
  0x18   :  { %vm97_vm3 = vcmp.eq.s32.totalorder %v597_v2, 0  ;;  %vm154_vm4 = vcmp.lt.s32.totalorder %v597_v2, 2  ;;  %v46_v18 = vadd.f32 %v42_v12, %v38_v10  ;;  %v47_v19 = vadd.f32 %v43_v13, %v39_v11  ;;  %v34_v21 = vld [vmem:[#allocation2 + $0x40] sm:$0xff]  ;;  %v35_v22 = vld [vmem:[#allocation2 + $0x48] sm:$0xff]  ;;  %v36_v23 = vld [vmem:[#allocation2 + $0x50] sm:$0xff]  ;;  %s556_s26 = smov 127  }
  0x19   :  { %v161_v20 = vsub.s32 2, %v597_v2  ;;  %v40_v24 = vmul.f32 0.299, %v32_v16  ;;  %vm171_vm5 = vcmp.eq.s32.totalorder %v597_v2, 1  ;;  %v37_v25 = vld [vmem:[#allocation2 + $0x58] sm:$0xff]  ;;  %v608_v27 = vadd.s32 8, %v597_v2 }
  0x1a   :  { %v44_v26 = vmul.f32 0.587, %v34_v21  ;;  %v78_v28 = vsub.s32 6, %v597_v2  ;;  %v611_v29 = vadd.f32 %v50_v14, %v46_v18  ;;  %v613_v30 = vadd.f32 %v51_v15, %v47_v19  ;;  %s557_s27 = smov 113   ;;  %s558_s28 = smov 126  }
  0x1b   :  { %v41_v31 = vmul.f32 0.299, %v33_v17  ;;  %v140_v32 = vsub.s32 5, %v597_v2  ;;  %v45_v33 = vmul.f32 0.587, %v35_v22  ;;  %vm75_vm6 = vcmp.eq.s32.totalorder %v608_v27, 15 }
  0x1c   :  { %v48_v34 = vadd.f32 %v44_v26, %v40_v24  ;;  %v52_v35 = vmul.f32 0.114, %v36_v23  ;;  %v53_v36 = vmul.f32 0.114, %v37_v25  ;;  %v58_v37 = vmul.f32 0.375, %v611_v29  ;;  %s559_s29 = smov 114  }
  0x1d   :  { %v62_v38 = vrot.slane %v611_v29, 1  ;;  %v64_v39 = vrot.slane %v613_v30, 1  ;;  %v88_v40 = vrot.slane %v611_v29, 7  ;;  %v90_v41 = vrot.slane %v613_v30, 7  ;;  %s560_s30 = smov [#allocation5]  }
  0x1e   :  { %v102_v42 = vrot.slane %v611_v29, %v101_v6  ;;  %v123_v43 = vrot.slane %v611_v29, 2  ;;  %v125_v44 = vrot.slane %v613_v30, 2  ;;  %v150_v46 = vrot.slane %v611_v29, 6  ;;  %s454_s4 = sshll.u32 %s560_s30, 4  ;;  %s455_s4 = int_to_ptr.vmem [resolvable:$true] %s454_s4 }
  0x1f   :  { %v69_v45 = vsel %vm68_vm0, %v62_v38, %v64_v39  ;;  %v152_v47 = vrot.slane %v613_v30, 6  ;;  %v162_v48 = vrot.slane %v611_v29, %v161_v20  ;;  %vm133_vm7 = vcmp.eq.s32.totalorder %v608_v27, 14  ;;  %s522_s5 = scalar_lea.vmem %s455_s4, 512  ;;  %p527_p9 = scmp.lt.s32.totalorder %s455_s4, %s455_s4 }
  0x20   :  { %v95_v49 = vsel %vm92_vm1, %v90_v41, %v88_v40  ;;  %v128_v50 = vsel %vm127_vm2, %v123_v43, %v125_v44  ;;  %v49_v51 = vadd.f32 %v45_v33, %v41_v31  ;;  %v639_v52 = vadd.f32 %v52_v35, %v48_v34  ;;  %p523_p8 = scmp.ne.s32.totalorder %s455_s4, %s522_s5  ;;  %p528_p10 = scmp.lt.s32.totalorder %s522_s5, %s522_s5 }
  0x21   :  { %v107_v53 = vsel %vm97_vm3, %v102_v42, %v95_v49  ;;  %v157_v54 = vsel %vm154_vm4, %v152_v47, %v150_v46  ;;  %v59_v55 = vmul.f32 0.375, %v613_v30  ;;  %v71_v56 = vsel %vm68_vm0, %v64_v39, %v62_v38 }
  0x22   :  { %v111_v57 = vadd.f32 %v107_v53, %v69_v45  ;;  %v167_v58 = vsel %vm97_vm3, %v162_v48, %v157_v54  ;;  %v650_v59 = vadd.f32 %v53_v36, %v49_v51  ;;  %v60_v60 = vmul.f32 0.375, %v639_v52  ;;  %p529_p11 = por %p528_p10, %p527_p9 }
  0x23   :  { %v173_v61 = vsel %vm171_vm5, %v102_v42, %v167_v58  ;;  %v63_v62 = vrot.slane %v639_v52, 1  ;;  %v89_v63 = vrot.slane %v639_v52, 7  ;;  %v106_v1 = vrot.slane %v639_v52, %v101_v6 }
  0x24   :  { %v115_v3 = vmul.f32 0.25, %v111_v57  ;;  %v177_v4 = vadd.f32 %v173_v61, %v128_v50  ;;  %v65_v5 = vrot.slane %v650_v59, 1  ;;  %v91_v7 = vrot.slane %v650_v59, 7  ;;  %p530_p12 = pnand %p529_p11, %p523_p8 }
  0x25   :  { %v124_v8 = vrot.slane %v639_v52, 2  ;;  %v126_v9 = vrot.slane %v650_v59, 2  ;;  %v151_v10 = vrot.slane %v639_v52, 6  ;;  %v153_v11 = vrot.slane %v650_v59, 6 }
  0x26   :  { %v119_v12 = vadd.f32 %v115_v3, %v58_v37  ;;  %v181_v13 = vmul.f32 0.0625, %v177_v4  ;;  %v70_v14 = vsel %vm68_vm0, %v63_v62, %v65_v5  ;;  %v96_v6 = vsel %vm92_vm1, %v91_v7, %v89_v63 }
  0x27   :  { %v109_v15 = vsel %vm97_vm3, %v106_v1, %v96_v6  ;;  %v129_v16 = vsel %vm127_vm2, %v124_v8, %v126_v9  ;;  %v158_v17 = vsel %vm154_vm4, %v153_v11, %v151_v10  ;;  %v166_v18 = vrot.slane %v639_v52, %v161_v20 }
  0x28   :  { %v679_v19 = vadd.f32 %v181_v13, %v119_v12  ;;  %v113_v21 = vadd.f32 %v109_v15, %v70_v14  ;;  %v79_v22 = vrot.slane %v613_v30, %v78_v28  ;;  %v93_v23 = vsel %vm92_vm1, %v88_v40, %v90_v41 }
  0x29   :  { %v169_v24 = vsel %vm97_vm3, %v166_v18, %v158_v17  ;;  %v130_v25 = vsel %vm127_vm2, %v125_v44, %v123_v43  ;;  %v141_v20 = vrot.slane %v613_v30, %v140_v32  ;;  %v155_v26 = vsel %vm154_vm4, %v150_v46, %v152_v47 }
  0x2a   :  { %194 = vrot.lane.b32.xlu0 %v679_v19, %s552_s0  ;;  %v117_v31 = vmul.f32 0.25, %v113_v21  ;;  %v175_v33 = vsel %vm171_vm5, %v106_v1, %v169_v24  ;;  %v85_v34 = vsel %vm75_vm6, %v79_v22, %v71_v56  ;;  %v135_v35 = vsel %vm133_vm7, %v79_v22, %v130_v25 }
  0x2b   :  { %v179_v36 = vadd.f32 %v175_v33, %v129_v16  ;;  %v112_v37 = vadd.f32 %v93_v23, %v85_v34  ;;  %v147_v38 = vsel %vm75_vm6, %v141_v20, %v135_v35  ;;  %v61_v39 = vmul.f32 0.375, %v650_v59 }
  0x2c   :  { %v121_v40 = vadd.f32 %v117_v31, %v60_v60  ;;  %v178_v41 = vadd.f32 %v155_v26, %v147_v38  ;;  %v72_v42 = vsel %vm68_vm0, %v65_v5, %v63_v62  ;;  %v83_v43 = vrot.slane %v650_v59, %v78_v28 }
  0x2d   :  { %v183_v44 = vmul.f32 0.0625, %v179_v36  ;;  %v116_v45 = vmul.f32 0.25, %v112_v37  ;;  %v94_v46 = vsel %vm92_vm1, %v89_v63, %v91_v7  ;;  %v131_v47 = vsel %vm127_vm2, %v126_v9, %v124_v8 }
  0x2e   :  { %v182_v48 = vmul.f32 0.0625, %v178_v41  ;;  %v87_v49 = vsel %vm75_vm6, %v83_v43, %v72_v42  ;;  %v137_v50 = vsel %vm133_vm7, %v83_v43, %v131_v47  ;;  %v145_v51 = vrot.slane %v650_v59, %v140_v32 }
  0x2f   :  { %v722_v28 = vadd.f32 %v183_v44, %v121_v40  ;;  %v120_v53 = vadd.f32 %v116_v45, %v59_v55  ;;  %v114_v54 = vadd.f32 %v94_v46, %v87_v49  ;;  %v156_v56 = vsel %vm154_vm4, %v151_v10, %v153_v11 }
  0x30   :  { %v149_v57 = vsel %vm75_vm6, %v145_v51, %v137_v50  ;;  %v553_v2 = vmov 1   ;;  %v554_v9 = vmov 2   ;;  %v555_v10 = vmov 13  }
  0x31   :  { %200 = vrot.lane.b32.xlu1 %v722_v28, %s552_s0  ;;  %v730_v58 = vadd.f32 %v182_v48, %v120_v53  ;;  %v118_v60 = vmul.f32 0.25, %v114_v54  ;;  %v180_v61 = vadd.f32 %v156_v56, %v149_v57  ;;  %v793_v46 = vand.u32 127, %v66_v0 }
  0x32   :  { %vm408_vm13 = vcmask 130048  }
  0x33   :  { %197 = vrot.lane.b32.xlu0 %v730_v58, %s552_s0  ;;  %v122_v32 = vadd.f32 %v118_v60, %v61_v39  ;;  %v184_v62 = vmul.f32 0.0625, %v180_v61  ;;  %vm261_vm9 = vcmp.eq.s32.totalorder %v793_v46, 0  ;;  %vm220_vm10 = vcmp.eq.s32.totalorder %v793_v46, 15 }
  0x34   :  { %vm306_vm11 = vcmp.eq.s32.totalorder %v793_v46, 14  ;;  %vm375_vm12 = vcmp.eq.s32.totalorder %v793_v46, 1 }
  0x35   :  { %v734_v55 = vadd.f32 %v184_v62, %v122_v32 }
  0x37   :  { %203 = vrot.lane.b32.xlu1 %v734_v55, %s552_s0  ;;  %223 = vperm.xlu0 %491, %v679_v19  }
  0x3b   :  { %228 = vperm.xlu1 %492, %v730_v58   ;;  %238 = vperm.xlu0 %491, %v734_v55  }
  0x3f   :  { %233 = vperm.xlu1 %492, %v722_v28   ;;  %494 = vset.pattern.permute.xlu0 %v553_v2 }
  0x43   :  { %493 = vset.pattern.permute.xlu1 %v553_v2 }
  0x44   :  { %263 = vperm.xlu1 %493, %v679_v19  }
  0x9c   :  { %v195_v27 = vpop.permute.xlu0 %194 }
  0x9d   :  { %v196_v63 = vsel %vm193_vm8, %v195_v27, %v679_v19  ;;  %v189_v27 = vmul.f32 0.375, %v679_v19 }
  0x9e   :  { %206 = vrot.lane.b32.xlu0 %v196_v63, %s552_s0 }
  0xa3   :  { %v201_v1 = vpop.permute.xlu1 %200 }
  0xa4   :  { %v202_v3 = vsel %vm193_vm8, %v201_v1, %v722_v28 }
  0xa5   :  { %v198_v4 = vpop.permute.xlu0 %197  ;;  %210 = vrot.lane.b32.xlu0 %v202_v3, %s552_s0 }
  0xa6   :  { %v199_v5 = vsel %vm193_vm8, %v198_v4, %v730_v58 }
  0xa7   :  { %208 = vrot.lane.b32.xlu1 %v199_v5, %s552_s0 }
  0xa9   :  { %v204_v7 = vpop.permute.xlu1 %203  ;;  %267 = vperm.xlu0 %494, %v730_v58  }
  0xaa   :  { %v205_v8 = vsel %vm193_vm8, %v204_v7, %v734_v55 }
  0xab   :  { %212 = vrot.lane.b32.xlu1 %v205_v8, %s552_s0 }
  0xad   :  { %495 = vset.pattern.permute.xlu0 %v554_v9 }
  0xae   :  { %344 = vperm.xlu0 %495, %v679_v19  }
  0xaf   :  { %271 = vperm.xlu1 %493, %v722_v28  }
  0xb2   :  { %356 = vperm.xlu0 %495, %v734_v55  }
  0xb3   :  { %275 = vperm.xlu1 %493, %v734_v55  }
  0xb6   :  { %498 = vset.pattern.permute.xlu0 %v555_v10  ;;  %v766_v11 = vpop.permute.xlu0 %223 }
  0xb7   :  { %496 = vset.pattern.permute.xlu1 %v554_v9  ;;  %328 = vperm.xlu0 %498, %v730_v58  }
  0xb8   :  { %348 = vperm.xlu1 %496, %v730_v58  }
  0xba   :  { %v768_v12 = vpop.permute.xlu1 %228  ;;  %v770_v13 = vpop.permute.xlu0 %238 }
  0xbb   :  { %499 = vset.pattern.permute.xlu0 %v554_v9 }
  0xbc   :  { %352 = vperm.xlu1 %496, %v722_v28  }
  0xbe   :  { %v772_v14 = vpop.permute.xlu1 %233 }
  0xc0   :  { %497 = vset.pattern.permute.xlu1 %v555_v10 }
  0xc1   :  { %324 = vperm.xlu1 %497, %v679_v19  }
  0xc3   :  { %v776_v16 = vpop.permute.xlu1 %263 }
  0xc5   :  { %332 = vperm.xlu1 %497, %v722_v28  }
  0xc9   :  { %336 = vperm.xlu1 %497, %v734_v55  }
 0x110   :  { %v207_v6 = vpop.permute.xlu0 %206 }
 0x111   :  { %v214_v15 = vsel %vm193_vm8, %v207_v6, %v679_v19  ;;  %v191_v6 = vmul.f32 0.375, %v722_v28 }
 0x112   :  { %245 = vrot.lane.b32.xlu0 %v214_v15, %s556_s26 }
 0x117   :  { %v211_v17 = vpop.permute.xlu0 %210 }
 0x118   :  { %v216_v18 = vsel %vm193_vm8, %v211_v17, %v722_v28 }
 0x119   :  { %v209_v21 = vpop.permute.xlu1 %208  ;;  %249 = vrot.lane.b32.xlu0 %v216_v18, %s556_s26 }
 0x11a   :  { %v215_v22 = vsel %vm193_vm8, %v209_v21, %v730_v58 }
 0x11b   :  { %247 = vrot.lane.b32.xlu1 %v215_v22, %s556_s26 }
 0x11d   :  { %v213_v23 = vpop.permute.xlu1 %212  ;;  %278 = vrot.lane.b32.xlu0 %v214_v15, %s557_s27 }
 0x11e   :  { %v217_v24 = vsel %vm193_vm8, %v213_v23, %v734_v55 }
 0x11f   :  { %251 = vrot.lane.b32.xlu1 %v217_v24, %s556_s26 }
 0x121   :  { %282 = vrot.lane.b32.xlu0 %v216_v18, %s557_s27 }
 0x123   :  { %280 = vrot.lane.b32.xlu1 %v215_v22, %s557_s27 }
 0x125   :  { %307 = vrot.lane.b32.xlu0 %v214_v15, %s558_s28 }
 0x127   :  { %284 = vrot.lane.b32.xlu1 %v217_v24, %s557_s27 }
 0x128   :  { %v786_v26 = vpop.permute.xlu0 %267 }
 0x129   :  { %311 = vrot.lane.b32.xlu0 %v216_v18, %s558_s28 }
 0x12b   :  { %309 = vrot.lane.b32.xlu1 %v215_v22, %s558_s28 }
 0x12d   :  { %359 = vrot.lane.b32.xlu0 %v214_v15, %s559_s29  ;;  %v345_v33 = vpop.permute.xlu0 %344 }
 0x12e   :  { %v272_v25 = vpop.permute.xlu1 %271 }
 0x12f   :  { %313 = vrot.lane.b32.xlu1 %v217_v24, %s558_s28 }
 0x131   :  { %363 = vrot.lane.b32.xlu0 %v216_v18, %s559_s29  ;;  %v788_v35 = vpop.permute.xlu0 %356 }
 0x132   :  { %v784_v20 = vpop.permute.xlu1 %275 }
 0x133   :  { %361 = vrot.lane.b32.xlu1 %v215_v22, %s559_s29 }
 0x136   :  { %v329_v37 = vpop.permute.xlu0 %328 }
 0x137   :  { %365 = vrot.lane.b32.xlu1 %v217_v24, %s559_s29  ;;  %v349_v31 = vpop.permute.xlu1 %348 }
 0x13b   :  { %v353_v34 = vpop.permute.xlu1 %352 }
 0x140   :  { %v325_v36 = vpop.permute.xlu1 %324 }
 0x144   :  { %v333_v38 = vpop.permute.xlu1 %332 }
 0x148   :  { %v790_v40 = vpop.permute.xlu1 %336 }
 0x184   :  { %v246_v39 = vpop.permute.xlu0 %245 }
 0x185   :  { %v257_v51 = vsel %vm220_vm10, %v766_v11, %v246_v39 }
 0x18b   :  { %v250_v41 = vpop.permute.xlu0 %249 }
 0x18c   :  { %v259_v57 = vsel %vm220_vm10, %v772_v14, %v250_v41 }
 0x18d   :  { %v248_v42 = vpop.permute.xlu1 %247 }
 0x18e   :  { %v258_v2 = vsel %vm220_vm10, %v768_v12, %v248_v42 }
 0x18f   :  { %v279_v43 = vpop.permute.xlu0 %278 }
 0x190   :  { %v290_v49 = vsel %vm261_vm9, %v776_v16, %v279_v43 }
 0x191   :  { %v252_v44 = vpop.permute.xlu1 %251  ;;  %v294_v0 = vadd.f32 %v290_v49, %v257_v51 }
 0x192   :  { %v260_v10 = vsel %vm220_vm10, %v770_v13, %v252_v44 }
 0x193   :  { %v283_v45 = vpop.permute.xlu0 %282  ;;  %v298_v63 = vmul.f32 0.25, %v294_v0 }
 0x194   :  { %v292_v54 = vsel %vm261_vm9, %v272_v25, %v283_v45 }
 0x195   :  { %v281_v47 = vpop.permute.xlu1 %280  ;;  %v296_v32 = vadd.f32 %v292_v54, %v259_v57 }
 0x196   :  { %v291_v60 = vsel %vm261_vm9, %v786_v26, %v281_v47 }
 0x197   :  { %v308_v48 = vpop.permute.xlu0 %307  ;;  %v295_v3 = vadd.f32 %v291_v60, %v258_v2  ;;  %v300_v15 = vmul.f32 0.25, %v296_v32 }
 0x198   :  { %v319_v61 = vsel %vm306_vm11, %v766_v11, %v308_v48  ;;  %v190_v11 = vmul.f32 0.375, %v730_v58 }
 0x199   :  { %v285_v50 = vpop.permute.xlu1 %284  ;;  %v339_v4 = vsel %vm220_vm10, %v325_v36, %v319_v61  ;;  %v299_v22 = vmul.f32 0.25, %v295_v3  ;;  %v304_v41 = vadd.f32 %v300_v15, %v191_v6 }
 0x19a   :  { %v293_v8 = vsel %vm261_vm9, %v784_v20, %v285_v50 }
 0x19b   :  { %v312_v53 = vpop.permute.xlu0 %311  ;;  %v297_v23 = vadd.f32 %v293_v8, %v260_v10  ;;  %v303_v44 = vadd.f32 %v299_v22, %v190_v11 }
 0x19c   :  { %v321_v19 = vsel %vm306_vm11, %v772_v14, %v312_v53 }
 0x19d   :  { %v310_v56 = vpop.permute.xlu1 %309  ;;  %v341_v24 = vsel %vm220_vm10, %v333_v38, %v321_v19  ;;  %v301_v45 = vmul.f32 0.25, %v297_v23 }
 0x19e   :  { %v320_v18 = vsel %vm306_vm11, %v768_v12, %v310_v56 }
 0x19f   :  { %v360_v62 = vpop.permute.xlu0 %359  ;;  %v340_v12 = vsel %vm220_vm10, %v329_v37, %v320_v18 }
 0x1a0   :  { %v371_v1 = vsel %vm261_vm9, %v345_v33, %v360_v62 }
 0x1a1   :  { %v314_v5 = vpop.permute.xlu1 %313  ;;  %v376_v7 = vsel %vm375_vm12, %v776_v16, %v371_v1  ;;  %v302_v16 = vadd.f32 %v298_v63, %v189_v27 }
 0x1a2   :  { %v380_v9 = vadd.f32 %v376_v7, %v339_v4  ;;  %v322_v38 = vsel %vm306_vm11, %v770_v13, %v314_v5 }
 0x1a3   :  { %v364_v17 = vpop.permute.xlu0 %363  ;;  %v342_v13 = vsel %vm220_vm10, %v790_v40, %v322_v38 }
 0x1a4   :  { %v384_v21 = vmul.f32 0.0625, %v380_v9  ;;  %v373_v14 = vsel %vm261_vm9, %v353_v34, %v364_v17 }
 0x1a5   :  { %v362_v33 = vpop.permute.xlu1 %361  ;;  %v378_v28 = vsel %vm375_vm12, %v272_v25, %v373_v14 }
 0x1a6   :  { %v388_v58 = vadd.f32 %v384_v21, %v302_v16  ;;  %v372_v36 = vsel %vm261_vm9, %v349_v31, %v362_v33  ;;  %v382_v39 = vadd.f32 %v378_v28, %v341_v24  ;;  %v192_v31 = vmul.f32 0.375, %v734_v55 }
 0x1a7   :  { %v377_v34 = vsel %vm375_vm12, %v786_v26, %v372_v36 }
 0x1a8   :  { %v392_v42 = vsub.f32 %v611_v29, %v388_v58  ;;  %v381_v25 = vadd.f32 %v377_v34, %v340_v12  ;;  %v386_v43 = vmul.f32 0.0625, %v382_v39  ;;  %v305_v0 = vadd.f32 %v301_v45, %v192_v31 }
 0x1a9   :  { %v366_v47 = vpop.permute.xlu1 %365 }
 0x1aa   :  { %v385_v48 = vmul.f32 0.0625, %v381_v25  ;;  %v390_v49 = vadd.f32 %v386_v43, %v304_v41  ;;  %v374_v37 = vsel %vm261_vm9, %v788_v35, %v366_v47  ;;  %v396_v26 = vadd.f32 0.5, %v392_v42 }
 0x1ab   :  { %v379_v29 = vsel %vm375_vm12, %v784_v20, %v374_v37 }
 0x1ac   :  { %v389_v50 = vadd.f32 %v385_v48, %v303_v44  ;;  %v394_v55 = vsub.f32 %v639_v52, %v390_v49  ;;  %v383_v51 = vadd.f32 %v379_v29, %v342_v13  ;;  %v400_v53 = vmax.f32 %v396_v26, 0.48 }
 0x1ae   :  { %v393_v54 = vsub.f32 %v613_v30, %v389_v50  ;;  %v387_v56 = vmul.f32 0.0625, %v383_v51  ;;  %v398_v35 = vadd.f32 0.5, %v394_v55  ;;  %v404_v57 = vmin.f32 %v400_v53, 0.52 }
 0x1b0   :  { %v391_v60 = vadd.f32 %v387_v56, %v305_v0  ;;  %v397_v61 = vadd.f32 0.5, %v393_v54  ;;  %v402_v32 = vmax.f32 %v398_v35, 0.48  ;;  %409 = vst.msk [vmem:[#allocation5] sm:$0xff] %vm408_vm13, %v404_v57  ;;  %v431_v1 = vsel %vm408_vm13, %v404_v57, -inf }
 0x1b1   :  { %v413_v3 = vsel %vm408_vm13, %v404_v57, inf }
 0x1b2   :  { %v395_v40 = vsub.f32 %v650_v59, %v391_v60  ;;  %v401_v20 = vmax.f32 %v397_v61, 0.48  ;;  %v406_v46 = vmin.f32 %v402_v32, 0.52 }
 0x1b4   :  { %v399_v62 = vadd.f32 0.5, %v395_v40  ;;  %v405_v52 = vmin.f32 %v401_v20, 0.52  ;;  %411 = vst.msk [vmem:[#allocation5 + $0x10] sm:$0xff] %vm408_vm13, %v406_v46  ;;  %v433_v59 = vsel %vm408_vm13, %v406_v46, -inf  ;;  %v415_v5 = vsel %vm408_vm13, %v406_v46, inf }
 0x1b6   :  { %v403_v2 = vmax.f32 %v399_v62, 0.48  ;;  %410 = vst.msk [vmem:[#allocation5 + $0x8] sm:$0xff] %vm408_vm13, %v405_v52  ;;  %v432_v27 = vsel %vm408_vm13, %v405_v52, -inf  ;;  %v414_v63 = vsel %vm408_vm13, %v405_v52, inf }
 0x1b7   :  { %v435_v8 = vmax.f32 %v431_v1, %v432_v27  ;;  %v417_v9 = vmin.f32 %v413_v3, %v414_v63 }
 0x1b8   :  { %v407_v30 = vmin.f32 %v403_v2, 0.52 }
 0x1ba   :  { %v434_v4 = vsel %vm408_vm13, %v407_v30, -inf  ;;  %412 = vst.msk [vmem:[#allocation5 + $0x18] sm:$0xff] %vm408_vm13, %v407_v30  ;;  %v416_v7 = vsel %vm408_vm13, %v407_v30, inf }
 0x1bb   :  { %v436_v19 = vmax.f32 %v433_v59, %v434_v4  ;;  %v418_v10 = vmin.f32 %v415_v5, %v416_v7 }
 0x1bd   :  { %v437_v11 = vmax.f32 %v435_v8, %v436_v19  ;;  %v419_v6 = vmin.f32 %v417_v9, %v418_v10 }
 0x1bf   :  { %438 = vmax.xlane.f32.xlu1 %v437_v11  ;;  %420 = vmin.xlane.f32.xlu0 %v419_v6 }
 0x1c0   :  { %533 = shalt.err (!%p530_p12)
}
 0x1c1   :  { %s534_s8 = scalar_lea.hbm %s905_s1, 512 }
 0x1c2   :  { %p535_p13 = scmp.ne.s32.totalorder %s905_s1, %s534_s8  ;;  %p538_p0 = scmp.lt.u32.totalorder %s534_s8, %s905_s1 }
 0x1c4   :  { %p540_p1 = pnand %p538_p0, %p535_p13 }
 0x1c6   :  { %543 = shalt.err (!%p540_p1)
}
 0x1c7   :  { %460 = dma.vmem_to_hbm [thread:$0]  %s455_s4, 512, %s905_s1, [#allocation4], %s549_s22, %s549_s22, %s550_s23  }
 0x24c   :  { %v439_v15 = vpop.xlane.xlu1 %438  ;;  %v421_v17 = vpop.xlane.xlu0 %420 }
 0x24d   :  { %v440_v16 = vrot.slane %v439_v15, 4  ;;  %v422_v18 = vrot.slane %v421_v17, 4 }
 0x24f   :  { %v441_v21 = vmax.f32 %v439_v15, %v440_v16  ;;  %v423_v14 = vmin.f32 %v421_v17, %v422_v18 }
 0x251   :  { %v442_v22 = vrot.slane %v441_v21, 2  ;;  %v424_v23 = vrot.slane %v423_v14, 2 }
 0x253   :  { %v443_v24 = vmax.f32 %v441_v21, %v442_v22  ;;  %v425_v33 = vmin.f32 %v423_v14, %v424_v23 }
 0x255   :  { %v426_v28 = vrot.slane %v425_v33, 1  ;;  %v444_v58 = vrot.slane %v443_v24, 1 }
 0x257   :  { %v427_v36 = vmin.f32 %v425_v33, %v426_v28  ;;  %v445_v39 = vmax.f32 %v443_v24, %v444_v58 }
 0x259   :  { %474 = vpush %v427_v36 }
 0x25a   :  { %476 = vpush %v445_v39 }
 0x28a   :  { %s475_s15 = spop %474 }
 0x28b   :  { %v429_v41 = vstv %s475_s15  ;;  %s477_s16 = spop %476 }
 0x28c   :  { %430 = vst [vmem:[%s906_s2] sm:$0xff] %v429_v41  ;;  %v447_v12 = vstv %s477_s16 }
 0x28d   :  { %448 = vst [vmem:[%s907_s3] sm:$0xff] %v447_v12 }
 0x28e   :  { %546 = dma.done.wait [#allocation4], 512  }
 0x28f   :  { %547 = vsyncadd [#allocation4], 4294966784 }
 0x290   :  { %472 = vsyncpa [#allocation3], 1 }
 0x291   :  { %473 = vsyncpa [#allocation4], 1 }

</bundles_post_ra>
